<compile_context>
chip_gen: v7x
topology: tpu7x:2x2x1
jax: 0.10.0
libtpu: 0.0.40
codegen_flags: <defaults>
</compile_context>

<pallas_src>
import functools

import jax
import jax.numpy as jnp
from jax import lax
from jax.experimental import pallas as pl
from jax.experimental.pallas import tpu as pltpu


def _se_block_kernel(x_ref, w1_ref, b1_ref, w2_ref, b2_ref, out_ref, acc_ref,
                     *, hw, t_hw, needs_mask):
    """Grid = (N, n_spatial_tiles).  One batch element per outer step."""
    s = pl.program_id(1)

    # --- init the per-channel sum accumulator at the start of each image ---
    @pl.when(s == 0)
    def _init():
        acc_ref[...] = jnp.zeros_like(acc_ref)

    # --- accumulate partial spatial sums (spatial on lanes -> lane-dense) ---
    x = x_ref[0].astype(jnp.float32)                     # (C, t_hw)
    if needs_mask:
        lane = lax.broadcasted_iota(jnp.int32, x.shape, 1) + s * t_hw
        x = jnp.where(lane < hw, x, 0.0)                 # zero OOB tail lanes
    acc_ref[...] += jnp.sum(x, axis=-1, keepdims=True)   # (C, 1)

    # --- finalize: mean, squeeze conv + relu, excite conv + sigmoid ---
    @pl.when(s == pl.num_programs(1) - 1)
    def _finalize():
        pooled = acc_ref[...] * (1.0 / hw)                              # (C, 1)
        y1 = jnp.dot(w1_ref[...], pooled,
                     preferred_element_type=jnp.float32) + b1_ref[...]  # (C_r, 1)
        y1 = jnp.maximum(y1, 0.0)
        y2 = jnp.dot(w2_ref[...], y1,
                     preferred_element_type=jnp.float32) + b2_ref[...]  # (C, 1)
        out_ref[0] = jax.nn.sigmoid(y2).astype(out_ref.dtype)


def se_block(x, params, *, block_bytes=4 << 20):
    """x: (N, C, H, W) NCHW like PyTorch.  Returns (N, C, 1, 1) SE gate."""
    w1, b1, w2, b2 = params
    N, C, H, W = x.shape
    C_r = w1.shape[0]
    HW = H * W
    itemsize = jnp.dtype(x.dtype).itemsize

    # Free, contiguous view of NCHW: spatial ends up on lanes.
    x3 = x.reshape(N, C, HW)

    # Spatial tile: whole image if it fits the per-block budget, else the
    # largest multiple of 128 within budget (tail handled by in-kernel mask).
    if HW <= 128 or C * HW * itemsize <= block_bytes:
        t_hw = HW
    else:
        t_hw = max(128, ((block_bytes // (C * itemsize)) // 128) * 128)
        t_hw = min(t_hw, HW)
    n_s = pl.cdiv(HW, t_hw)
    needs_mask = (HW % t_hw) != 0

    # Tiny weights/biases stay in f32 (cast in wrapper; they are a few KB).
    w1f = w1.astype(jnp.float32)
    w2f = w2.astype(jnp.float32)
    b1c = b1.astype(jnp.float32).reshape(C_r, 1)
    b2c = b2.astype(jnp.float32).reshape(C, 1)

    in_block_bytes = C * t_hw * itemsize
    vmem_limit = int(min(112 * (1 << 20), max(32 * (1 << 20), 6 * in_block_bytes)))

    kernel = functools.partial(_se_block_kernel,
                               hw=HW, t_hw=t_hw, needs_mask=needs_mask)

    out3 = pl.pallas_call(
        kernel,
        out_shape=jax.ShapeDtypeStruct((N, C, 1), x.dtype),
        grid=(N, n_s),
        in_specs=[
            pl.BlockSpec((1, C, t_hw), lambda n, s: (n, 0, s)),  # x (lane-dense)
            pl.BlockSpec((C_r, C), lambda n, s: (0, 0)),         # W1 (squeeze)
            pl.BlockSpec((C_r, 1), lambda n, s: (0, 0)),         # b1
            pl.BlockSpec((C, C_r), lambda n, s: (0, 0)),         # W2 (excite)
            pl.BlockSpec((C, 1), lambda n, s: (0, 0)),           # b2
        ],
        out_specs=pl.BlockSpec((1, C, 1), lambda n, s: (n, 0, 0)),
        scratch_shapes=[pltpu.VMEM((C, 1), jnp.float32)],        # pooled-sum acc
        compiler_params=pltpu.CompilerParams(
            dimension_semantics=("parallel", "arbitrary"),
            vmem_limit_bytes=vmem_limit),
    )(x3, w1f, b1c, w2f, b2c)

    # Free reshape: (N, C, 1) -> (N, C, 1, 1), matching the PyTorch output.
    return out3.reshape(N, C, 1, 1)


def _reference(x, params):
    """Pure-JAX reference of SE_Block.forward for a sanity check."""
    w1, b1, w2, b2 = params
    pooled = jnp.mean(x.astype(jnp.float32), axis=(2, 3))       # (N, C)
    y1 = jnp.maximum(pooled @ w1.T + b1, 0.0)                   # (N, C//16)
    y2 = jax.nn.sigmoid(y1 @ w2.T + b2)                         # (N, C)
    return y2[:, :, None, None]


if __name__ == "__main__":
    # in_planes must be >= 16 for the C//16 squeeze; use a small SE-style shape.
    N, C, H, W = 2, 64, 16, 16
    C_r = C // 16

    key = jax.random.PRNGKey(0)
    kx, k1, k2, k3, k4 = jax.random.split(key, 5)
    x = jax.random.normal(kx, (N, C, H, W), jnp.float32)
    w1 = 0.1 * jax.random.normal(k1, (C_r, C), jnp.float32)   # Conv2d(C, C//16, 1)
    b1 = 0.1 * jax.random.normal(k2, (C_r,), jnp.float32)
    w2 = 0.1 * jax.random.normal(k3, (C, C_r), jnp.float32)   # Conv2d(C//16, C, 1)
    b2 = 0.1 * jax.random.normal(k4, (C,), jnp.float32)
    params = (w1, b1, w2, b2)

    out = se_block(x, params)
    out = jax.block_until_ready(out)

    ref = _reference(x, params)
    assert out.shape == (N, C, 1, 1)
    assert jnp.allclose(out, ref.astype(out.dtype), atol=1e-5, rtol=1e-5)

    print("KERNEL_OK")
</pallas_src>

<mosaic_0001>
module attributes {stable_mosaic.version = 11 : i64} {
  func.func @_se_block_kernel(%arg0: i32, %arg1: i32, %arg2: memref<1x64x256xf32, #tpu.memory_space<vmem>>, %arg3: memref<4x64xf32, #tpu.memory_space<vmem>>, %arg4: memref<4x1xf32, #tpu.memory_space<vmem>>, %arg5: memref<64x4xf32, #tpu.memory_space<vmem>>, %arg6: memref<64x1xf32, #tpu.memory_space<vmem>>, %arg7: memref<1x64x1xf32, #tpu.memory_space<vmem>>, %arg8: memref<64x1xf32, #tpu.memory_space<vmem>>) attributes {dimension_semantics = [#tpu.dimension_semantics<parallel>, #tpu.dimension_semantics<arbitrary>], iteration_bounds = array<i64: 2, 1>, scalar_prefetch = 0 : i64, scratch_operands = 1 : i64, tpu.core_type = #tpu.core_type<tc>, window_params = [{transform_indices = @transform_0, window_bounds = array<i64: 1, 64, 256>}, {pipeline_mode = #tpu.pipeline_mode<synchronous>, transform_indices = @transform_1, window_bounds = array<i64: 4, 64>}, {pipeline_mode = #tpu.pipeline_mode<synchronous>, transform_indices = @transform_2, window_bounds = array<i64: 4, 1>}, {pipeline_mode = #tpu.pipeline_mode<synchronous>, transform_indices = @transform_3, window_bounds = array<i64: 64, 4>}, {pipeline_mode = #tpu.pipeline_mode<synchronous>, transform_indices = @transform_4, window_bounds = array<i64: 64, 1>}, {transform_indices = @transform_5, window_bounds = array<i64: 1, 64, 1>}]} {
    %c0_i32 = arith.constant 0 : i32
    %0 = arith.cmpi eq, %arg1, %c0_i32 : i32
    %1 = arith.extui %0 : i1 to i32
    %c0_i32_0 = arith.constant 0 : i32
    %2 = arith.cmpi ne, %1, %c0_i32_0 : i32
    scf.if %2 {
      %cst_9 = arith.constant 0.000000e+00 : f32
      %13 = vector.broadcast %cst_9 : f32 to vector<64x1xf32>
      %c0_10 = arith.constant 0 : index
      %c0_11 = arith.constant 0 : index
      %14 = vector.load %arg8[%c0_10, %c0_11] : memref<64x1xf32, #tpu.memory_space<vmem>>, vector<64x1xf32>
      tpu.vector_store %arg8[%c0_10, %c0_11], %13 {strides = array<i32>} : memref<64x1xf32, #tpu.memory_space<vmem>>, vector<64x1xf32>,
    } else {
    }
    %c0 = arith.constant 0 : index
    %c0_1 = arith.constant 0 : index
    %c0_2 = arith.constant 0 : index
    %3 = vector.load %arg2[%c0, %c0_1, %c0_2] : memref<1x64x256xf32, #tpu.memory_space<vmem>>, vector<1x64x256xf32>
    %4 = vector.shape_cast %3 : vector<1x64x256xf32> to vector<64x256xf32>
    %c0_3 = arith.constant 0 : index
    %c0_4 = arith.constant 0 : index
    %5 = vector.load %arg8[%c0_3, %c0_4] : memref<64x1xf32, #tpu.memory_space<vmem>>, vector<64x1xf32>
    %cst = arith.constant dense<0.000000e+00> : vector<64xf32>
    %6 = vector.multi_reduction <add>, %4, %cst [1] : vector<64x256xf32> to vector<64xf32>
    %7 = vector.shape_cast %6 : vector<64xf32> to vector<64x1xf32>
    %8 = arith.addf %5, %7 : vector<64x1xf32>
    %c0_5 = arith.constant 0 : index
    %c0_6 = arith.constant 0 : index
    %9 = vector.load %arg8[%c0_5, %c0_6] : memref<64x1xf32, #tpu.memory_space<vmem>>, vector<64x1xf32>
    tpu.vector_store %arg8[%c0_5, %c0_6], %8 {strides = array<i32>} : memref<64x1xf32, #tpu.memory_space<vmem>>, vector<64x1xf32>,
    %c0_i32_7 = arith.constant 0 : i32
    %10 = arith.cmpi eq, %arg1, %c0_i32_7 : i32
    %11 = arith.extui %10 : i1 to i32
    %c0_i32_8 = arith.constant 0 : i32
    %12 = arith.cmpi ne, %11, %c0_i32_8 : i32
    scf.if %12 {
      %c0_9 = arith.constant 0 : index
      %c0_10 = arith.constant 0 : index
      %13 = vector.load %arg8[%c0_9, %c0_10] : memref<64x1xf32, #tpu.memory_space<vmem>>, vector<64x1xf32>
      %cst_11 = arith.constant 3.906250e-03 : f32
      %14 = vector.broadcast %cst_11 : f32 to vector<64x1xf32>
      %15 = arith.mulf %13, %14 : vector<64x1xf32>
      %c0_12 = arith.constant 0 : index
      %c0_13 = arith.constant 0 : index
      %16 = vector.load %arg3[%c0_12, %c0_13] : memref<4x64xf32, #tpu.memory_space<vmem>>, vector<4x64xf32>
      %cst_14 = arith.constant dense<0.000000e+00> : vector<4x1xf32>
      %17 = tpu.matmul %16, %15, %cst_14 {dimension_numbers = #tpu.dot_dimension_numbers<[1], [0], [0], [1], [0, 0, 1, 1], [], []>} : vector<4x64xf32>, vector<64x1xf32>, vector<4x1xf32> -> vector<4x1xf32>
      %c0_15 = arith.constant 0 : index
      %c0_16 = arith.constant 0 : index
      %18 = vector.load %arg4[%c0_15, %c0_16] : memref<4x1xf32, #tpu.memory_space<vmem>>, vector<4x1xf32>
      %19 = arith.addf %17, %18 : vector<4x1xf32>
      %cst_17 = arith.constant 0.000000e+00 : f32
      %20 = vector.broadcast %cst_17 : f32 to vector<4x1xf32>
      %21 = arith.maximumf %19, %20 : vector<4x1xf32>
      %c0_18 = arith.constant 0 : index
      %c0_19 = arith.constant 0 : index
      %22 = vector.load %arg5[%c0_18, %c0_19] : memref<64x4xf32, #tpu.memory_space<vmem>>, vector<64x4xf32>
      %cst_20 = arith.constant dense<0.000000e+00> : vector<64x1xf32>
      %23 = tpu.matmul %22, %21, %cst_20 {dimension_numbers = #tpu.dot_dimension_numbers<[1], [0], [0], [1], [0, 0, 1, 1], [], []>} : vector<64x4xf32>, vector<4x1xf32>, vector<64x1xf32> -> vector<64x1xf32>
      %c0_21 = arith.constant 0 : index
      %c0_22 = arith.constant 0 : index
      %24 = vector.load %arg6[%c0_21, %c0_22] : memref<64x1xf32, #tpu.memory_space<vmem>>, vector<64x1xf32>
      %25 = arith.addf %23, %24 : vector<64x1xf32>
      %26 = arith.negf %25 : vector<64x1xf32>
      %27 = math.exp %26 : vector<64x1xf32>
      %cst_23 = arith.constant 1.000000e+00 : f32
      %28 = vector.broadcast %cst_23 : f32 to vector<64x1xf32>
      %29 = arith.addf %28, %27 : vector<64x1xf32>
      %30 = arith.divf %28, %29 : vector<64x1xf32>
      %c0_24 = arith.constant 0 : index
      %c0_25 = arith.constant 0 : index
      %c0_26 = arith.constant 0 : index
      %31 = vector.load %arg7[%c0_24, %c0_25, %c0_26] : memref<1x64x1xf32, #tpu.memory_space<vmem>>, vector<1x64x1xf32>
      %32 = vector.shape_cast %31 : vector<1x64x1xf32> to vector<64x1xf32>
      %33 = vector.shape_cast %30 : vector<64x1xf32> to vector<1x64x1xf32>
      tpu.vector_store %arg7[%c0_24, %c0_25, %c0_26], %33 {strides = array<i32>} : memref<1x64x1xf32, #tpu.memory_space<vmem>>, vector<1x64x1xf32>,
    } else {
    }
    return
  }
  func.func @transform_0(%arg0: i32, %arg1: i32) -> (i32, i32, i32) {
    %c0_i32 = arith.constant 0 : i32
    %c0_i32_0 = arith.constant 0 : i32
    return %arg0, %c0_i32, %arg1 : i32, i32, i32
  }
  func.func @transform_1(%arg0: i32, %arg1: i32) -> (i32, i32) {
    %c0_i32 = arith.constant 0 : i32
    %c0_i32_0 = arith.constant 0 : i32
    %c0_i32_1 = arith.constant 0 : i32
    return %c0_i32, %c0_i32_0 : i32, i32
  }
  func.func @transform_2(%arg0: i32, %arg1: i32) -> (i32, i32) {
    %c0_i32 = arith.constant 0 : i32
    %c0_i32_0 = arith.constant 0 : i32
    %c0_i32_1 = arith.constant 0 : i32
    return %c0_i32, %c0_i32_0 : i32, i32
  }
  func.func @transform_3(%arg0: i32, %arg1: i32) -> (i32, i32) {
    %c0_i32 = arith.constant 0 : i32
    %c0_i32_0 = arith.constant 0 : i32
    %c0_i32_1 = arith.constant 0 : i32
    return %c0_i32, %c0_i32_0 : i32, i32
  }
  func.func @transform_4(%arg0: i32, %arg1: i32) -> (i32, i32) {
    %c0_i32 = arith.constant 0 : i32
    %c0_i32_0 = arith.constant 0 : i32
    %c0_i32_1 = arith.constant 0 : i32
    return %c0_i32, %c0_i32_0 : i32, i32
  }
  func.func @transform_5(%arg0: i32, %arg1: i32) -> (i32, i32, i32) {
    %c0_i32 = arith.constant 0 : i32
    %c0_i32_0 = arith.constant 0 : i32
    %c0_i32_1 = arith.constant 0 : i32
    return %arg0, %c0_i32, %c0_i32_0 : i32, i32, i32
  }
}

</mosaic_0001>

<bundles_post_ra>
// kernel: tpu_custom_call.1
= control target key start
LH: loop header
LB: loop body
LE: loop exit
PB: predicated region body
PF: predicated region fallthrough
CT: control target
= control target key end

     0   :  { %10 = vsyncpa [#allocation4], 0  ;;  %s1254_s0 = inlined_call_operand.hbm [shape: f32[2,64,256], index: 0, kind: input, shape index: {}]   ;;  %s1255_s1 = inlined_call_operand.vmem [shape: f32[4,64], index: 1, kind: input, shape index: {}]   ;;  %s1256_s2 = inlined_call_operand.vmem [shape: f32[4,1], index: 2, kind: input, shape index: {}]   ;;  %s1257_s3 = inlined_call_operand.vmem [shape: f32[64,4], index: 3, kind: input, shape index: {}]   ;;  %s1258_s4 = inlined_call_operand.vmem [shape: f32[64,1], index: 4, kind: input, shape index: {}]   ;;  %s1259_s5 = inlined_call_operand.vmem [shape: f32[2,64,1], index: 5, kind: output, shape index: {}]  }
   0x1   :  { %12 = vsyncpa [#allocation4 + $0x1], 0  ;;  %s1026_s18 = smov 0   ;;  %s1028_s19 = smov 0  }
   0x2   :  { %s1030_s20 = smov 0   ;;  %s1032_s21 = smov 0  }
   0x3   :  { %s1034_s22 = smov 0   ;;  %s1036_s23 = smov 0  }
   0x4 LB: > { %s720_s24 = sadd.s32 4294967295, %s988_s23   ;;  %s30_s25 = sadd.s32 1, %s984_s22  ;;  %s988_s23 = sphi %s1036_s23, %s18_s23   ;;  %s984_s22 = sphi %s1034_s22, %s1267_s22   ;;  %s980_s21 = sphi %s1032_s21, %s1266_s21   ;;  %s976_s20 = sphi %s1030_s20, %s1265_s20   ;;  %s972_s19 = sphi %s1028_s19, %s1264_s19   ;;  %s968_s18 = sphi %s1026_s18, %s1263_s18  }
   0x5   : > { %p32_p0 = scmp.ge.s32.totalorder %s30_s25, 2  ;;  %s39_s26 = sadd.s32 1, %s976_s20 }
   0x6   : > { %p46_p1 = scmp.ne.s32.totalorder %s976_s20, %s972_s19  ;;  %p47_p2 = scmp.eq.s32.totalorder %s988_s23, 0 }
   0x7   : > { %s1269_s25 = smov (%p32_p0, %s30_s25), 0  ;;  %p52_p4 = scmp.ne.s32.totalorder %s972_s19, %s968_s18 }
   0x8   : > { %p1062_p3 = por %p47_p2, %p46_p1  ;;  %s34_s28 = ssub.s32 %s984_s22, %s1269_s25 }
   0x9   : > { %p53_p5 = scmp.eq.s32.totalorder %s720_s24, 0  ;;  %p37_p6 = scmp.eq.s32.totalorder %s34_s28, 0 }
   0xa   : > { %p822_p8 = scmp.lt.s32.totalorder %s988_s23, 2  ;;  %s198_s6 = sand.u32 1, %s976_s20  }
   0xb   : > { %p1069_p7 = por %p53_p5, %p52_p4  ;;  %s751_s7 = sshll.u32 %s984_s22, 11 }
   0xc   : > { %s1075_s30 = scalar_select %p37_p6, %s976_s20, %s39_s26  }
   0xd   : > { %s724_s8 = sshll.u32 %s198_s6, 7  ;;  %s1082_s11 = scalar_lea.hbm %s1254_s0, %s751_s7 }
   0xe   : > { %s202_s12 = scalar_lea.vmem [#allocation3], %s724_s8  ;;  %p1086_p9 = pnand %p822_p8, %p1062_p3 }
   0xf   : > { %s211_s13 = sshll.u32 %s202_s12, 4  ;;  %s1092_s15 = scalar_lea.sflag [#allocation4], %s198_s6  ;;  %s1090_s13 = int_to_ptr.vmem [resolvable:$true] %s211_s13 }
  0x10   : > { %s908_s16 = scalar_lea.hbm %s1082_s11, 2048  ;;  %p910_p11 = pneg %p1086_p9 }
  0x11   : > { %p909_p10 = scmp.ne.s32.totalorder %s1082_s11, %s908_s16  ;;  %s913_s24 = scalar_lea.hbm %s1254_s0, 4096 }
  0x12   : > { %p914_p0 = scmp.lt.u32.totalorder %s1082_s11, %s1254_s0  ;;  %p915_p1 = scmp.lt.u32.totalorder %s913_s24, %s908_s16 }
  0x13   : > { %p911_p12 = pnand %p910_p11, %p909_p10  ;;  %p917_p3 = scmp.lt.u32.totalorder %s908_s16, %s1082_s11 }
  0x14   : > { %p916_p2 = por %p915_p1, %p914_p0 }
  0x15   : > { %p912_p13 = pneg %p911_p12 }
  0x16   : > { %p918_p4 = por %p917_p3, %p916_p2 }
  0x18   : > { %p919_p5 = pnand %p918_p4, %p912_p13 }
  0x1a   : > { %922 = shalt.err (!%p919_p5)
}
  0x1b   : > { %s923_s28 = scalar_lea.vmem %s1090_s13, 2048  ;;  %s990_s6 = smov [#allocation3]  }
  0x1c   : > { %p924_p6 = scmp.ne.s32.totalorder %s1090_s13, %s923_s28  ;;  %s928_s7 = sshll.u32 %s990_s6, 4  ;;  %s929_s7 = int_to_ptr.vmem [resolvable:$false] %s928_s7 }
  0x1d   : > { %s930_s8 = scalar_lea.vmem %s929_s7, 4096  ;;  %p931_p12 = scmp.lt.s32.totalorder %s1090_s13, %s929_s7 }
  0x1e   : > { %p926_p8 = pnand %p924_p6, %p910_p11  ;;  %p932_p0 = scmp.lt.s32.totalorder %s930_s8, %s923_s28 }
  0x20   : > { %p927_p10 = pneg %p926_p8  ;;  %p933_p1 = por %p932_p0, %p931_p12 }
  0x22   : > { %p934_p2 = pnand %p933_p1, %p927_p10 }
  0x24   : > { %937 = shalt.err (!%p934_p2)
}
  0x25   : > { %s991_s9 = smov 256   ;;  %s992_s10 = smov 16  }
  0x26   : > { %821 = dma.hbm_to_vmem [thread:$0]  (!%p1086_p9), %s1082_s11, 2048, %s1090_s13, %s1092_s15, %s991_s9, %s991_s9, %s992_s10  }
  0x27   : > { %p727_p11 = scmp.ge.s32.totalorder %s988_s23, 1  ;;  %p219_p13 = scmp.lt.s32.totalorder %s988_s23, 3 }
  0x29   : > { %p220_p3 = pnand %p727_p11, %p219_p13 }
  0x2a   : > { %s225_s12 = sand.u32 (!%p220_p3), 1, %s972_s19  }
  0x2b   : > { %223 = sbr.rel (%p220_p3) target bundleno = 704 (0x2c0), region = 40  ;;  %s728_s16 = sshll.u32 (!%p220_p3), %s225_s12, 7 }
  0x2c   : > { %s226_s17 = scalar_lea.sflag (!%p220_p3), [#allocation4], %s225_s12  ;;  %s1123_s18 = scalar_lea.vmem (!%p220_p3), [#allocation3], %s728_s16 }
  0x32   : > { %963 = dma.done.wait (%p1069_p7), %s226_s17, 2048  }
  0x33   : > { %965 = vsyncadd (%p1069_p7), %s226_s17, 4294965248  ;;  %vm266_vm0 = vcmask 7168   ;;  %v993_v0 = vmov 0.0   ;;  %v279_v1 = vld [vmem:[%s1123_s18 + $0x20] sm:$0xff]  ;;  %v280_v2 = vld [vmem:[%s1123_s18 + $0x28] sm:$0xff]  ;;  %v994_v25 = vmov 0.0|0.0  }
  0x34   : > { %269 = vst.msk [vmem:[#allocation2 + $0x10] sm:$0xff] %vm266_vm0, %v993_v0  ;;  %267 = vst.msk [vmem:[#allocation2] sm:$0xff] %vm266_vm0, %v993_v0  ;;  %v275_v3 = vld [vmem:[%s1123_s18] sm:$0xff]  ;;  %v305_v4 = vadd.f32 %v280_v2, %v279_v1  ;;  %v276_v5 = vld [vmem:[%s1123_s18 + $0x8] sm:$0xff]  ;;  %804 = vmatprep.subr.bf16.mxu0 %v994_v25  ;;  %vm995_vm1 = vmmov 0   ;;  %vm361_vm2 = vcmask 523264  }
  0x35   : > { %268 = vst.msk [vmem:[#allocation2 + $0x8] sm:$0xff] %vm266_vm0, %v993_v0  ;;  %270 = vst.msk [vmem:[#allocation2 + $0x18] sm:$0xff] %vm266_vm0, %v993_v0  ;;  %v281_v6 = vld [vmem:[%s1123_s18 + $0x30] sm:$0xff]  ;;  %v282_v7 = vld [vmem:[%s1123_s18 + $0x38] sm:$0xff]  ;;  %v299_v8 = vadd.f32 %v276_v5, %v275_v3  ;;  %787 = vmatprep.mubr.msk.f32.mxu0 %vm995_vm1, %v993_v0  ;;  %vm452_vm3 = vcmask 31744   ;;  %vm477_vm4 = vcmask 1043456  }
  0x36   : > { %271 = vst.msk [vmem:[#allocation2 + $0x20] sm:$0xff] %vm266_vm0, %v993_v0  ;;  %272 = vst.msk [vmem:[#allocation2 + $0x28] sm:$0xff] %vm266_vm0, %v993_v0  ;;  %v277_v9 = vld [vmem:[%s1123_s18 + $0x10] sm:$0xff]  ;;  %v278_v10 = vld [vmem:[%s1123_s18 + $0x18] sm:$0xff]  ;;  %306 = vadd.xlane.f32.xlu1 %v305_v4  ;;  %v308_v11 = vadd.f32 %v282_v7, %v281_v6  ;;  %p257_p7 = scmp.lt.s32.totalorder %s980_s21, 1 }
  0x37   : > { %273 = vst.msk [vmem:[#allocation2 + $0x30] sm:$0xff] %vm266_vm0, %v993_v0  ;;  %274 = vst.msk [vmem:[#allocation2 + $0x38] sm:$0xff] %vm266_vm0, %v993_v0  ;;  %300 = vadd.xlane.f32.xlu0 %v299_v8  ;;  %v302_v12 = vadd.f32 %v278_v10, %v277_v9  ;;  %v285_v13 = vld [vmem:[%s1123_s18 + $0x50] sm:$0xff]  ;;  %v286_v14 = vld [vmem:[%s1123_s18 + $0x58] sm:$0xff] }
  0x38   : > { %v283_v15 = vld [vmem:[%s1123_s18 + $0x40] sm:$0xff]  ;;  %v284_v16 = vld [vmem:[%s1123_s18 + $0x48] sm:$0xff]  ;;  %v314_v17 = vadd.f32 %v286_v14, %v285_v13  ;;  %v289_v19 = vld [vmem:[%s1123_s18 + $0x70] sm:$0xff]  ;;  %s1271_s21 = smov (!%p257_p7, %s980_s21), 1 }
  0x39   : > { %v311_v18 = vadd.f32 %v284_v16, %v283_v15  ;;  %v290_v20 = vld [vmem:[%s1123_s18 + $0x78] sm:$0xff]  ;;  %v287_v21 = vld [vmem:[%s1123_s18 + $0x60] sm:$0xff]  ;;  %v288_v22 = vld [vmem:[%s1123_s18 + $0x68] sm:$0xff]  ;;  %s752_s29 = sshll.u32 %s1271_s21, 6 }
  0x3a   : > { %309 = vadd.xlane.f32.xlu1 %v308_v11  ;;  %v320_v23 = vadd.f32 %v290_v20, %v289_v19  ;;  %v317_v24 = vadd.f32 %v288_v22, %v287_v21  ;;  %v359_v6 = vld [vmem:[%s1255_s1] sm:$0xf]  ;;  %v437_v13 = vld [vmem:[%s1257_s3 + $0x8] sm:$0xff]  ;;  %v438_v14 = vld [vmem:[%s1257_s3 + $0x10] sm:$0xff]  ;;  %s261_s14 = scalar_lea.vmem %s1259_s5, %s752_s29 }
  0x3b   : > { %303 = vadd.xlane.f32.xlu0 %v302_v12  ;;  %v293_v26 = vld [vmem:[#allocation2 + $0x10] sm:$0xff]  ;;  %v291_v27 = vld [vmem:[#allocation2] sm:$0xff]  ;;  %v439_v15 = vld [vmem:[%s1257_s3 + $0x18] sm:$0xff] }
  0x3c   : > { %v294_v32 = vld [vmem:[#allocation2 + $0x18] sm:$0xff]  ;;  %v292_v33 = vld [vmem:[#allocation2 + $0x8] sm:$0xff]  ;;  %v436_v7 = vld [vmem:[%s1257_s3] sm:$0xff] }
  0x3d   : > { %v296_v38 = vld [vmem:[#allocation2 + $0x28] sm:$0xff]  ;;  %v295_v39 = vld [vmem:[#allocation2 + $0x20] sm:$0xff]  ;;  %792 = vmatprep.mubr.msk.f32.mxu1 %vm452_vm3, %v436_v7  ;;  %v443_v19 = vld [vmem:[%s1257_s3 + $0x38] sm:$0xff] }
  0x3e   : > { %315 = vadd.xlane.f32.xlu1 %v314_v17  ;;  %v298_v44 = vld [vmem:[#allocation2 + $0x38] sm:$0xff]  ;;  %v297_v45 = vld [vmem:[#allocation2 + $0x30] sm:$0xff]  ;;  %v360_v8 = vld [vmem:[%s1256_s2] sm:$0xf] }
  0x3f   : > { %312 = vadd.xlane.f32.xlu0 %v311_v18  ;;  %v440_v16 = vld [vmem:[%s1257_s3 + $0x20] sm:$0xff]  ;;  %v441_v17 = vld [vmem:[%s1257_s3 + $0x28] sm:$0xff]  ;;  %v442_v18 = vld [vmem:[%s1257_s3 + $0x30] sm:$0xff] }
  0x40   : > { %v445_v20 = vld [vmem:[%s1258_s4 + $0x8] sm:$0xff]  ;;  %v444_v21 = vld [vmem:[%s1258_s4] sm:$0xff] }
  0x42   : > { %321 = vadd.xlane.f32.xlu1 %v320_v23 }
  0x43   : > { %318 = vadd.xlane.f32.xlu0 %v317_v24 }
  0xc3   : > { %v307_v28 = vpop.xlane.xlu1 %306 }
  0xc4   : > { %v325_v29 = vadd.f32 %v307_v28, %v293_v26  ;;  %v301_v30 = vpop.xlane.xlu0 %300  ;;  %v447_v26 = vld [vmem:[%s1258_s4 + $0x18] sm:$0xff]  ;;  %v446_v28 = vld [vmem:[%s1258_s4 + $0x10] sm:$0xff] }
  0xc5   : > { %v323_v31 = vadd.f32 %v301_v30, %v291_v27 }
  0xc6   : > { %334 = vst.msk [vmem:[#allocation2 + $0x10] sm:$0xff] %vm266_vm0, %v325_v29 }
  0xc7   : > { %332 = vst.msk [vmem:[#allocation2] sm:$0xff] %vm266_vm0, %v323_v31  ;;  %v310_v34 = vpop.xlane.xlu1 %309 }
  0xc8   : > { %v326_v35 = vadd.f32 %v310_v34, %v294_v32  ;;  %v304_v36 = vpop.xlane.xlu0 %303  ;;  %v449_v34 = vld [vmem:[%s1258_s4 + $0x28] sm:$0xff] }
  0xc9   : > { %v324_v37 = vadd.f32 %v304_v36, %v292_v33  ;;  %v448_v36 = vld [vmem:[%s1258_s4 + $0x20] sm:$0xff] }
  0xca   : > { %335 = vst.msk [vmem:[#allocation2 + $0x18] sm:$0xff] %vm266_vm0, %v326_v35 }
  0xcb   : > { %333 = vst.msk [vmem:[#allocation2 + $0x8] sm:$0xff] %vm266_vm0, %v324_v37  ;;  %v316_v40 = vpop.xlane.xlu1 %315 }
  0xcc   : > { %v328_v41 = vadd.f32 %v316_v40, %v296_v38  ;;  %v313_v42 = vpop.xlane.xlu0 %312 }
  0xcd   : > { %v327_v43 = vadd.f32 %v313_v42, %v295_v39  ;;  %v345_v52 = vld [vmem:[#allocation2 + $0x10] sm:$0xff]  ;;  %v451_v42 = vld [vmem:[%s1258_s4 + $0x38] sm:$0xff] }
  0xce   : > { %337 = vst.msk [vmem:[#allocation2 + $0x28] sm:$0xff] %vm266_vm0, %v328_v41  ;;  %v343_v49 = vld [vmem:[#allocation2] sm:$0xff]  ;;  %v353_v57 = vmul.f32 0.00390625, %v345_v52 }
  0xcf   : > { %336 = vst.msk [vmem:[#allocation2 + $0x20] sm:$0xff] %vm266_vm0, %v327_v43  ;;  %v322_v46 = vpop.xlane.xlu1 %321  ;;  %v351_v54 = vmul.f32 0.00390625, %v343_v49 }
  0xd0   : > { %v330_v47 = vadd.f32 %v322_v46, %v298_v44  ;;  %v319_v48 = vpop.xlane.xlu0 %318  ;;  %v450_v44 = vld [vmem:[%s1258_s4 + $0x30] sm:$0xff] }
  0xd1   : > { %v329_v50 = vadd.f32 %v319_v48, %v297_v45  ;;  %v346_v53 = vld [vmem:[#allocation2 + $0x18] sm:$0xff] }
  0xd2   : > { %339 = vst.msk [vmem:[#allocation2 + $0x38] sm:$0xff] %vm266_vm0, %v330_v47  ;;  %v344_v51 = vld [vmem:[#allocation2 + $0x8] sm:$0xff]  ;;  %v354_v58 = vmul.f32 0.00390625, %v346_v53 }
  0xd3   : > { %338 = vst.msk [vmem:[#allocation2 + $0x30] sm:$0xff] %vm266_vm0, %v329_v50  ;;  %v352_v55 = vmul.f32 0.00390625, %v344_v51 }
  0xd4   : > { %v808_v63 = vpack.c.bf16 %v354_v58, %v353_v57 }
  0xd5   : > { %v805_v56 = vpack.c.bf16 %v352_v55, %v351_v54  ;;  %v348_v59 = vld [vmem:[#allocation2 + $0x28] sm:$0xff] }
  0xd6   : > { %v347_v60 = vld [vmem:[#allocation2 + $0x20] sm:$0xff]  ;;  %v356_v62 = vmul.f32 0.00390625, %v348_v59 }
  0xd7   : > { %806 = vmatpush3.bf16.msra.mxu0 %v805_v56  ;;  %v355_v61 = vmul.f32 0.00390625, %v347_v60 }
  0xd8   : > { %807 = vmatprep.subr.bf16.mxu0 %v994_v25 }
  0xd9   : > { %v350_v0 = vld [vmem:[#allocation2 + $0x38] sm:$0xff]  ;;  %v811_v2 = vpack.c.bf16 %v356_v62, %v355_v61 }
  0xda   : > { %v349_v1 = vld [vmem:[#allocation2 + $0x30] sm:$0xff]  ;;  %v358_v4 = vmul.f32 0.00390625, %v350_v0 }
  0xdb   : > { %809 = vmatpush3.bf16.msra.mxu0 %v808_v63  ;;  %v357_v3 = vmul.f32 0.00390625, %v349_v1 }
  0xdc   : > { %810 = vmatprep.subr.bf16.mxu0 %v994_v25 }
  0xdd   : > { %v814_v5 = vpack.c.bf16 %v358_v4, %v357_v3 }
  0xdf   : > { %812 = vmatpush3.bf16.msra.mxu0 %v811_v2 }
  0xe0   : > { %813 = vmatprep.subr.bf16.mxu0 %v994_v25 }
  0xe3   : > { %815 = vmatpush3.bf16.msra.mxu0 %v814_v5 }
  0xe6   : > { %788 = vmatmul.mubr.msk.f32.vlgmr.msra.gmra.mrb[0].mxu0 %vm361_vm2, %v359_v6 }
 0x1b9   : > { %v431_v9 = vpop.f32.mrb[0].mxu0 }
 0x1ba   : > { %v432_v10 = vadd.f32 %v431_v9, %v360_v8  ;;  %v789_v11 = vpop.f32.mrb[1].mxu0 }
 0x1bc   : > { %v435_v12 = vmax.f32 %v432_v10, 0.0 }
 0x1be   : > { %790 = vmatprep.subr.msk.mxu1 %vm477_vm4, %v435_v12 }
 0x1bf   : > { %791 = vmatpush3.msk.msra.mxu1 %vm477_vm4, %v435_v12 }
 0x1c0   : > { %793 = vmatmul.mubr.msk.f32.vlgmr.msra.gmra.mrb[0].mxu1 %vm452_vm3, %v437_v13 }
 0x1c1   : > { %795 = vmatprep.mubr.msk.f32.mxu1 %vm452_vm3, %v438_v14 }
 0x1c4   : > { %796 = vmatmul.mubr.msk.f32.gmra.mrb[2].mxu1 %vm452_vm3, %v439_v15 }
 0x1c5   : > { %798 = vmatprep.mubr.msk.f32.mxu1 %vm452_vm3, %v440_v16 }
 0x1c8   : > { %799 = vmatmul.mubr.msk.f32.gmra.mrb[4].mxu1 %vm452_vm3, %v441_v17 }
 0x1c9   : > { %801 = vmatprep.mubr.msk.f32.mxu1 %vm452_vm3, %v442_v18 }
 0x1cc   : > { %802 = vmatmul.mubr.msk.f32.gmra.mrb[6].mxu1 %vm452_vm3, %v443_v19 }
 0x293   : > { %v794_v22 = vpop.f32.mrb[0].mxu1 }
 0x294   : > { %v553_v23 = vadd.f32 %v794_v22, %v445_v20  ;;  %v547_v24 = vpop.f32.mrb[1].mxu1 }
 0x295   : > { %v548_v25 = vadd.f32 %v547_v24, %v444_v21 }
 0x296   : > { %v742_v27 = vmul.f32 -1.442695, %v553_v23 }
 0x297   : > { %v741_v29 = vmul.f32 -1.442695, %v548_v25  ;;  %v797_v30 = vpop.f32.mrb[2].mxu1 }
 0x298   : > { %876 = vpow2.f32 %v742_v27  ;;  %v563_v31 = vadd.f32 %v797_v30, %v447_v26  ;;  %v557_v32 = vpop.f32.mrb[3].mxu1 }
 0x299   : > { %878 = vpow2.f32 %v741_v29  ;;  %v558_v33 = vadd.f32 %v557_v32, %v446_v28 }
 0x29a   : > { %v744_v35 = vmul.f32 -1.442695, %v563_v31 }
 0x29b   : > { %v743_v37 = vmul.f32 -1.442695, %v558_v33  ;;  %v800_v38 = vpop.f32.mrb[4].mxu1 }
 0x29c   : > { %880 = vpow2.f32 %v744_v35  ;;  %v573_v39 = vadd.f32 %v800_v38, %v449_v34  ;;  %v567_v40 = vpop.f32.mrb[5].mxu1 }
 0x29d   : > { %882 = vpow2.f32 %v743_v37  ;;  %v568_v41 = vadd.f32 %v567_v40, %v448_v36 }
 0x29e   : > { %v746_v43 = vmul.f32 -1.442695, %v573_v39 }
 0x29f   : > { %v745_v45 = vmul.f32 -1.442695, %v568_v41  ;;  %v803_v46 = vpop.f32.mrb[6].mxu1 }
 0x2a0   : > { %884 = vpow2.f32 %v746_v43  ;;  %v583_v47 = vadd.f32 %v803_v46, %v451_v42  ;;  %v577_v48 = vpop.f32.mrb[7].mxu1 }
 0x2a1   : > { %886 = vpow2.f32 %v745_v45  ;;  %v578_v49 = vadd.f32 %v577_v48, %v450_v44 }
 0x2a2   : > { %v877_v50 = vpop.eup %876  ;;  %v748_v51 = vmul.f32 -1.442695, %v583_v47 }
 0x2a3   : > { %v879_v52 = vpop.eup %878  ;;  %v611_v53 = vadd.f32 1.0, %v877_v50  ;;  %v747_v54 = vmul.f32 -1.442695, %v578_v49 }
 0x2a4   : > { %v610_v55 = vadd.f32 1.0, %v879_v52  ;;  %888 = vpow2.f32 %v748_v51 }
 0x2a5   : > { %890 = vrcp.f32 %v611_v53 }
 0x2a6   : > { %v881_v56 = vpop.eup %880  ;;  %892 = vrcp.f32 %v610_v55 }
 0x2a7   : > { %v883_v57 = vpop.eup %882  ;;  %v613_v58 = vadd.f32 1.0, %v881_v56  ;;  %894 = vpow2.f32 %v747_v54 }
 0x2a8   : > { %v612_v59 = vadd.f32 1.0, %v883_v57 }
 0x2a9   : > { %896 = vrcp.f32 %v613_v58 }
 0x2aa   : > { %v885_v60 = vpop.eup %884  ;;  %898 = vrcp.f32 %v612_v59 }
 0x2ab   : > { %v887_v61 = vpop.eup %886  ;;  %v615_v62 = vadd.f32 1.0, %v885_v60 }
 0x2ac   : > { %v614_v63 = vadd.f32 1.0, %v887_v61 }
 0x2ad   : > { %900 = vrcp.f32 %v615_v62 }
 0x2ae   : > { %v889_v0 = vpop.eup %888  ;;  %902 = vrcp.f32 %v614_v63 }
 0x2af   : > { %v891_v1 = vpop.eup %890  ;;  %v617_v2 = vadd.f32 1.0, %v889_v0 }
 0x2b0   : > { %v893_v3 = vpop.eup %892  ;;  %635 = vst.msk [vmem:[%s261_s14 + $0x8] sm:$0xff] %vm266_vm0, %v891_v1 }
 0x2b1   : > { %v895_v4 = vpop.eup %894  ;;  %634 = vst.msk [vmem:[%s261_s14] sm:$0xff] %vm266_vm0, %v893_v3  ;;  %904 = vrcp.f32 %v617_v2 }
 0x2b2   : > { %v616_v5 = vadd.f32 1.0, %v895_v4 }
 0x2b3   : > { %v897_v6 = vpop.eup %896 }
 0x2b4   : > { %v899_v7 = vpop.eup %898  ;;  %637 = vst.msk [vmem:[%s261_s14 + $0x18] sm:$0xff] %vm266_vm0, %v897_v6  ;;  %906 = vrcp.f32 %v616_v5 }
 0x2b5   : > { %636 = vst.msk [vmem:[%s261_s14 + $0x10] sm:$0xff] %vm266_vm0, %v899_v7 }
 0x2b7   : > { %v901_v8 = vpop.eup %900 }
 0x2b8   : > { %v903_v9 = vpop.eup %902  ;;  %639 = vst.msk [vmem:[%s261_s14 + $0x28] sm:$0xff] %vm266_vm0, %v901_v8 }
 0x2b9   : > { %638 = vst.msk [vmem:[%s261_s14 + $0x20] sm:$0xff] %vm266_vm0, %v903_v9 }
 0x2bb   : > { %v905_v10 = vpop.eup %904 }
 0x2bc   : > { %641 = vst.msk [vmem:[%s261_s14 + $0x38] sm:$0xff] %vm266_vm0, %v905_v10 }
 0x2be   : > { %v907_v11 = vpop.eup %906 }
 0x2bf   : > { %640 = vst.msk [vmem:[%s261_s14 + $0x30] sm:$0xff] %vm266_vm0, %v907_v11 }
 0x2c0 PF: > { %s18_s23 = sadd.s32 1, %s988_s23   ;;  %s1263_s18 = smov %s972_s19 }
 0x2c1   : > { %p15_p9 = scmp.ge.s32.totalorder %s18_s23, 4   ;;  %s1264_s19 = smov %s976_s20 }
 0x2c2   : > { %s1265_s20 = smov %s1075_s30  ;;  %s1266_s21 = smov %s984_s22 }
 0x2c3   : > { %s1267_s22 = smov %s1269_s25  ;;  %17 = sbr.rel (!%p15_p9) target bundleno = 4 (0x4), region = 88 }
 0x2ca   :  { %663 = vsyncpa [#allocation4], 1 }
 0x2cb   :  { %665 = vsyncpa [#allocation4 + $0x1], 1 }

</bundles_post_ra>
